<compile_context>
chip_gen: v6e
topology: v6e:2x2x1
jax: 0.10.0
libtpu: 0.0.40
codegen_flags: <defaults>
</compile_context>

<pallas_src>
import math

import jax
import jax.numpy as jnp
from jax.experimental import pallas as pl
from jax.experimental.pallas import tpu as pltpu


# ---------------------------------------------------------------------------
# Kernel 1: fused SE excitation gates for BOTH branches (one matmul pair).
# ---------------------------------------------------------------------------
def se_gates_kernel(p_ref, u_ref, v_ref, y_ref):
    """p_ref: [B, C] pooled; u_ref: [C, 2*Ch] (u1|u2); v_ref: [2*Ch, 2*C]
    block-diag(v1, v2); y_ref: [B, 2*C] (cols [0:C] branch-1, [C:2C] branch-2)."""
    h = jnp.maximum(
        jnp.dot(p_ref[...], u_ref[...], preferred_element_type=jnp.float32), 0.0)
    z = jnp.dot(h, v_ref[...], preferred_element_type=jnp.float32)
    y_ref[...] = 1.0 / (1.0 + jnp.exp(-z))            # sigmoid (exp on EUP)


# ---------------------------------------------------------------------------
# Kernel 2: the two big flattened fc layers.
# Grid = (branch [parallel], contraction blocks [arbitrary, last]).
# Output block is resident across the contraction axis (f32 accumulator).
# ---------------------------------------------------------------------------
def osme_fc_kernel(xg_ref, w_ref, b_ref, o_ref):
    k = pl.program_id(1)

    @pl.when(k == 0)
    def _init():
        o_ref[...] = jnp.broadcast_to(b_ref[...], o_ref.shape)

    # bf16 x bf16 -> f32 accumulation on the MXU.
    o_ref[...] += jnp.dot(xg_ref[...], w_ref[...],
                          preferred_element_type=jnp.float32)


# ---------------------------------------------------------------------------
# Wrapper
# ---------------------------------------------------------------------------
def osme_forward(x, params, *, n_block_cap=8192, weight_buf_budget=24 * 2**20):
    """x: [B, C, H, W] (NCHW). Returns (out1, out2), each [B, d]."""
    B, C, H, W = x.shape
    HW = H * W
    N = C * HW
    d = params["w1t"].shape[1]
    Ch = params["v1"].shape[0]

    x3 = x.reshape(B, C, HW).astype(jnp.float32)

    # ---- SE gates: tiny pooled reduction wrapper-side, fused MLPs in Pallas -
    pooled = jnp.mean(x3, axis=-1)                                    # [B, C]
    u_cat = jnp.concatenate([params["u1"], params["u2"]], axis=1)     # [C, 2Ch]
    v_bd = jnp.zeros((2 * Ch, 2 * C), jnp.float32)
    v_bd = v_bd.at[:Ch, :C].set(params["v1"]).at[Ch:, C:].set(params["v2"])

    vmem = pl.BlockSpec(memory_space=pltpu.MemorySpace.VMEM)
    gates = pl.pallas_call(
        se_gates_kernel,
        out_shape=jax.ShapeDtypeStruct((B, 2 * C), jnp.float32),
        in_specs=[vmem, vmem, vmem],
        out_specs=vmem,
    )(pooled, u_cat, v_bd)

    # ---- branch-stacked, gated, bf16 activations (single input stream) -----
    y = jnp.stack([gates[:, :C], gates[:, C:]], axis=0)               # [2, B, C]
    xg = (x3[None] * y[..., None]).astype(jnp.bfloat16).reshape(2, B, N)

    # ---- input-independent weight packing: bf16, branch-stacked ------------
    w = jnp.stack([params["w1t"], params["w2t"]], axis=0).astype(jnp.bfloat16)
    b = jnp.stack([params["b1"], params["b2"]], axis=0)               # [2,1,d] f32
    # TODO(synk): optional fp8 (v7x) / int8 (v5e/v6e) weight quantization with
    # per-block scales would halve weight bytes again; kept at bf16 for accuracy.

    # ---- contraction tile: largest 128-multiple divisor of N within budget --
    assert N % 128 == 0, N
    max_nb_by_vmem = max(128, (weight_buf_budget // (2 * d * 2)) // 128 * 128)
    cap = max(128, min(N, n_block_cap, max_nb_by_vmem))
    nb = 128
    for cand in range(cap, 127, -128):
        if N % cand == 0:
            nb = cand
            break
    grid = (2, N // nb)

    x_spec = pl.BlockSpec((None, B, nb), lambda br, k: (br, 0, k))
    w_spec = pl.BlockSpec((None, nb, d), lambda br, k: (br, k, 0))
    b_spec = pl.BlockSpec((None, 1, d), lambda br, k: (br, 0, 0))
    o_spec = pl.BlockSpec((None, B, d), lambda br, k: (br, 0, 0))

    # Explicit VMEM budget: double-buffered weight + activation streams,
    # resident output, bias.  Clamped so it is safe on v5e/v6e/v7x.
    vmem_need = 2 * (nb * d * 2 + B * nb * 2) + 2 * d * 4 + B * d * 4
    vmem_limit = int(min(max(2 * vmem_need, 16 * 2**20), 48 * 2**20))

    out = pl.pallas_call(
        osme_fc_kernel,
        out_shape=jax.ShapeDtypeStruct((2, B, d), jnp.float32),
        grid=grid,
        in_specs=[x_spec, w_spec, b_spec],
        out_specs=o_spec,
        compiler_params=pltpu.CompilerParams(
            dimension_semantics=("parallel", "arbitrary"),
            vmem_limit_bytes=vmem_limit),
    )(xg, w, b)
    return out[0], out[1]


# ---------------------------------------------------------------------------
# Pure-JAX reference (mirrors the PyTorch module exactly, f32 weights).
# ---------------------------------------------------------------------------
def reference_forward(x, params):
    B, C, H, W = x.shape
    xf = x.reshape(B, C, H * W).astype(jnp.float32)
    pooled = jnp.mean(xf, axis=-1)

    def se(u, v):
        h = jnp.maximum(pooled @ u, 0.0)
        return jax.nn.sigmoid(h @ v)

    y1 = se(params["u1"], params["v1"])
    y2 = se(params["u2"], params["v2"])
    o1 = (xf * y1[:, :, None]).reshape(B, -1) @ params["w1t"] + params["b1"][0]
    o2 = (xf * y2[:, :, None]).reshape(B, -1) @ params["w2t"] + params["b2"][0]
    return o1, o2


def make_params(key, C, w, d, reduction=16):
    HW = w * w
    N = C * HW
    Ch = max(C // reduction, 1)
    ks = jax.random.split(key, 8)

    def uinit(k, fan_in, fan_out):
        lim = math.sqrt(6.0 / (fan_in + fan_out))
        return jax.random.uniform(k, (fan_in, fan_out), jnp.float32, -lim, lim)

    return {
        # SEBlock linear weights, stored transposed as [in, out]
        "u1": uinit(ks[0], C, Ch),       # se1.fc[0].weight.T
        "v1": uinit(ks[1], Ch, C),       # se1.fc[2].weight.T
        "u2": uinit(ks[2], C, Ch),       # se2.fc[0].weight.T
        "v2": uinit(ks[3], Ch, C),       # se2.fc[2].weight.T
        # fc1 / fc2 stored transposed as [C*w*w, d]; row order matches
        # PyTorch flatten(start_dim=1) of NCHW, i.e. index = c*HW + h*W + w.
        "w1t": uinit(ks[4], N, d),       # fc1.weight.T
        "b1": 0.1 * jax.random.normal(ks[5], (1, d), jnp.float32),
        "w2t": uinit(ks[6], N, d),       # fc2.weight.T
        "b2": 0.1 * jax.random.normal(ks[7], (1, d), jnp.float32),
    }


if __name__ == "__main__":
    B, C, Hs, Ws = 2, 64, 8, 8           # in_block=64, w=8
    d, reduction = 128, 16

    key = jax.random.PRNGKey(0)
    kx, kp = jax.random.split(key)
    x = jax.random.normal(kx, (B, C, Hs, Ws), jnp.float32)
    params = make_params(kp, C, Ws, d, reduction)

    fwd = jax.jit(osme_forward)
    out1, out2 = fwd(x, params)
    jax.block_until_ready((out1, out2))

    ref1, ref2 = reference_forward(x, params)
    assert out1.shape == (B, d) and out2.shape == (B, d)
    assert jnp.allclose(out1, ref1, rtol=5e-2, atol=5e-2), \
        float(jnp.max(jnp.abs(out1 - ref1)))
    assert jnp.allclose(out2, ref2, rtol=5e-2, atol=5e-2), \
        float(jnp.max(jnp.abs(out2 - ref2)))
    print("KERNEL_OK")
</pallas_src>

<mosaic_0001>
module attributes {stable_mosaic.version = 11 : i64} {
  func.func @se_gates_kernel(%arg0: memref<2x64xf32, #tpu.memory_space<vmem>>, %arg1: memref<64x8xf32, #tpu.memory_space<vmem>>, %arg2: memref<8x128xf32, #tpu.memory_space<vmem>>, %arg3: memref<2x128xf32, #tpu.memory_space<vmem>>) attributes {dimension_semantics = [], scalar_prefetch = 0 : i64, scratch_operands = 0 : i64, tpu.core_type = #tpu.core_type<tc>} {
    %c0 = arith.constant 0 : index
    %c0_0 = arith.constant 0 : index
    %0 = vector.load %arg0[%c0, %c0_0] : memref<2x64xf32, #tpu.memory_space<vmem>>, vector<2x64xf32>
    %c0_1 = arith.constant 0 : index
    %c0_2 = arith.constant 0 : index
    %1 = vector.load %arg1[%c0_1, %c0_2] : memref<64x8xf32, #tpu.memory_space<vmem>>, vector<64x8xf32>
    %cst = arith.constant dense<0.000000e+00> : vector<2x8xf32>
    %2 = tpu.matmul %0, %1, %cst {dimension_numbers = #tpu.dot_dimension_numbers<[1], [0], [0], [1], [0, 0, 1, 1], [], []>} : vector<2x64xf32>, vector<64x8xf32>, vector<2x8xf32> -> vector<2x8xf32>
    %cst_3 = arith.constant 0.000000e+00 : f32
    %3 = vector.broadcast %cst_3 : f32 to vector<2x8xf32>
    %4 = arith.maximumf %2, %3 : vector<2x8xf32>
    %c0_4 = arith.constant 0 : index
    %c0_5 = arith.constant 0 : index
    %5 = vector.load %arg2[%c0_4, %c0_5] : memref<8x128xf32, #tpu.memory_space<vmem>>, vector<8x128xf32>
    %cst_6 = arith.constant dense<0.000000e+00> : vector<2x128xf32>
    %6 = tpu.matmul %4, %5, %cst_6 {dimension_numbers = #tpu.dot_dimension_numbers<[1], [0], [0], [1], [0, 0, 1, 1], [], []>} : vector<2x8xf32>, vector<8x128xf32>, vector<2x128xf32> -> vector<2x128xf32>
    %cst_7 = arith.constant 0.000000e+00 : f32
    %7 = vector.broadcast %cst_7 : f32 to vector<2x128xf32>
    %8 = arith.subf %7, %6 : vector<2x128xf32>
    %9 = math.exp %8 : vector<2x128xf32>
    %cst_8 = arith.constant 1.000000e+00 : f32
    %10 = vector.broadcast %cst_8 : f32 to vector<2x128xf32>
    %11 = arith.addf %10, %9 : vector<2x128xf32>
    %cst_9 = arith.constant 1.000000e+00 : f32
    %12 = vector.broadcast %cst_9 : f32 to vector<2x128xf32>
    %13 = arith.divf %12, %11 : vector<2x128xf32>
    %c0_10 = arith.constant 0 : index
    %c0_11 = arith.constant 0 : index
    %14 = vector.load %arg3[%c0_10, %c0_11] : memref<2x128xf32, #tpu.memory_space<vmem>>, vector<2x128xf32>
    tpu.vector_store %arg3[%c0_10, %c0_11], %13 {strides = array<i32>} : memref<2x128xf32, #tpu.memory_space<vmem>>, vector<2x128xf32>,
    return
  }
}

module attributes {stable_mosaic.version = 11 : i64} {
  func.func @osme_fc_kernel(%arg0: i32, %arg1: i32, %arg2: memref<1x2x4096xbf16, #tpu.memory_space<vmem>>, %arg3: memref<1x4096x128xbf16, #tpu.memory_space<vmem>>, %arg4: memref<1x1x128xf32, #tpu.memory_space<vmem>>, %arg5: memref<1x2x128xf32, #tpu.memory_space<vmem>>) attributes {dimension_semantics = [#tpu.dimension_semantics<parallel>, #tpu.dimension_semantics<arbitrary>], iteration_bounds = array<i64: 2, 1>, scalar_prefetch = 0 : i64, scratch_operands = 0 : i64, tpu.core_type = #tpu.core_type<tc>, window_params = [{transform_indices = @transform_0, window_bounds = array<i64: 1, 2, 4096>}, {transform_indices = @transform_1, window_bounds = array<i64: 1, 4096, 128>}, {transform_indices = @transform_2, window_bounds = array<i64: 1, 1, 128>}, {transform_indices = @transform_3, window_bounds = array<i64: 1, 2, 128>}]} {
    %c0_i32 = arith.constant 0 : i32
    %0 = arith.cmpi eq, %arg1, %c0_i32 : i32
    %1 = arith.extui %0 : i1 to i32
    %c0_i32_0 = arith.constant 0 : i32
    %2 = arith.cmpi ne, %1, %c0_i32_0 : i32
    scf.if %2 {
      %c0_12 = arith.constant 0 : index
      %c0_13 = arith.constant 0 : index
      %c0_14 = arith.constant 0 : index
      %14 = vector.load %arg4[%c0_12, %c0_13, %c0_14] : memref<1x1x128xf32, #tpu.memory_space<vmem>>, vector<1x1x128xf32>
      %15 = vector.shape_cast %14 : vector<1x1x128xf32> to vector<1x128xf32>
      %16 = vector.shape_cast %15 : vector<1x128xf32> to vector<1x128xf32>
      %17 = vector.broadcast %16 : vector<1x128xf32> to vector<2x128xf32>
      %c0_15 = arith.constant 0 : index
      %c0_16 = arith.constant 0 : index
      %c0_17 = arith.constant 0 : index
      %18 = vector.load %arg5[%c0_15, %c0_16, %c0_17] : memref<1x2x128xf32, #tpu.memory_space<vmem>>, vector<1x2x128xf32>
      %19 = vector.shape_cast %18 : vector<1x2x128xf32> to vector<2x128xf32>
      %20 = vector.shape_cast %17 : vector<2x128xf32> to vector<1x2x128xf32>
      tpu.vector_store %arg5[%c0_15, %c0_16, %c0_17], %20 {strides = array<i32>} : memref<1x2x128xf32, #tpu.memory_space<vmem>>, vector<1x2x128xf32>,
    } else {
    }
    %c0 = arith.constant 0 : index
    %c0_1 = arith.constant 0 : index
    %c0_2 = arith.constant 0 : index
    %3 = vector.load %arg5[%c0, %c0_1, %c0_2] : memref<1x2x128xf32, #tpu.memory_space<vmem>>, vector<1x2x128xf32>
    %4 = vector.shape_cast %3 : vector<1x2x128xf32> to vector<2x128xf32>
    %c0_3 = arith.constant 0 : index
    %c0_4 = arith.constant 0 : index
    %c0_5 = arith.constant 0 : index
    %5 = vector.load %arg2[%c0_3, %c0_4, %c0_5] : memref<1x2x4096xbf16, #tpu.memory_space<vmem>>, vector<1x2x4096xbf16>
    %6 = vector.shape_cast %5 : vector<1x2x4096xbf16> to vector<2x4096xbf16>
    %c0_6 = arith.constant 0 : index
    %c0_7 = arith.constant 0 : index
    %c0_8 = arith.constant 0 : index
    %7 = vector.load %arg3[%c0_6, %c0_7, %c0_8] : memref<1x4096x128xbf16, #tpu.memory_space<vmem>>, vector<1x4096x128xbf16>
    %8 = vector.shape_cast %7 : vector<1x4096x128xbf16> to vector<4096x128xbf16>
    %cst = arith.constant dense<0.000000e+00> : vector<2x128xf32>
    %9 = tpu.matmul %6, %8, %cst {dimension_numbers = #tpu.dot_dimension_numbers<[1], [0], [0], [1], [0, 0, 1, 1], [], []>} : vector<2x4096xbf16>, vector<4096x128xbf16>, vector<2x128xf32> -> vector<2x128xf32>
    %10 = arith.addf %4, %9 : vector<2x128xf32>
    %c0_9 = arith.constant 0 : index
    %c0_10 = arith.constant 0 : index
    %c0_11 = arith.constant 0 : index
    %11 = vector.load %arg5[%c0_9, %c0_10, %c0_11] : memref<1x2x128xf32, #tpu.memory_space<vmem>>, vector<1x2x128xf32>
    %12 = vector.shape_cast %11 : vector<1x2x128xf32> to vector<2x128xf32>
    %13 = vector.shape_cast %10 : vector<2x128xf32> to vector<1x2x128xf32>
    tpu.vector_store %arg5[%c0_9, %c0_10, %c0_11], %13 {strides = array<i32>} : memref<1x2x128xf32, #tpu.memory_space<vmem>>, vector<1x2x128xf32>,
    return
  }
  func.func @transform_0(%arg0: i32, %arg1: i32) -> (i32, i32, i32) {
    %c0_i32 = arith.constant 0 : i32
    %c0_i32_0 = arith.constant 0 : i32
    return %arg0, %c0_i32, %arg1 : i32, i32, i32
  }
  func.func @transform_1(%arg0: i32, %arg1: i32) -> (i32, i32, i32) {
    %c0_i32 = arith.constant 0 : i32
    %c0_i32_0 = arith.constant 0 : i32
    return %arg0, %arg1, %c0_i32 : i32, i32, i32
  }
  func.func @transform_2(%arg0: i32, %arg1: i32) -> (i32, i32, i32) {
    %c0_i32 = arith.constant 0 : i32
    %c0_i32_0 = arith.constant 0 : i32
    %c0_i32_1 = arith.constant 0 : i32
    return %arg0, %c0_i32, %c0_i32_0 : i32, i32, i32
  }
  func.func @transform_3(%arg0: i32, %arg1: i32) -> (i32, i32, i32) {
    %c0_i32 = arith.constant 0 : i32
    %c0_i32_0 = arith.constant 0 : i32
    %c0_i32_1 = arith.constant 0 : i32
    return %arg0, %c0_i32, %c0_i32_0 : i32, i32, i32
  }
}

</mosaic_0001>

<bundles_post_ra>
// kernel: osme_forward.2
= control target key start
LH: loop header
LB: loop body
LE: loop exit
PB: predicated region body
PF: predicated region fallthrough
CT: control target
= control target key end

     0   :  { %v227_v0 = vmov 0.0   ;;  %vm228_vm0 = vmmov 0   ;;  %vm23_vm1 = vcmask 523264   ;;  %vm99_vm2 = vcmask 64512   ;;  %s282_s1 = inlined_call_operand.vmem [shape: f32[64,8], index: 1, kind: input, shape index: {}]   ;;  %s283_s0 = inlined_call_operand.vmem [shape: f32[2,64], index: 0, kind: input, shape index: {}]   ;;  %s284_s2 = inlined_call_operand.vmem [shape: f32[8,128], index: 2, kind: input, shape index: {}]   ;;  %s285_s3 = inlined_call_operand.vmem [shape: f32[2,128], index: 3, kind: output, shape index: {}]  }
   0x1   :  { %197 = vmatprep.subr.mxu0 %v227_v0  ;;  %v22_v1 = vld [vmem:[%s282_s1 + $0x38] sm:$0xff]  ;;  %v21_v2 = vld [vmem:[%s282_s1 + $0x30] sm:$0xff]  ;;  %213 = vmatprep.mubr.msk.f32.mxu0 %vm228_vm0, %v227_v0  ;;  %v20_v3 = vld [vmem:[%s282_s1 + $0x28] sm:$0xff] }
   0x2   :  { %198 = vmatpush3.msra.mxu0 %v22_v1  ;;  %216 = vmatprep.subr.mxu1 %v227_v0  ;;  %v19_v4 = vld [vmem:[%s282_s1 + $0x20] sm:$0xff]  ;;  %v18_v5 = vld [vmem:[%s282_s1 + $0x18] sm:$0xff]  ;;  %v17_v6 = vld [vmem:[%s282_s1 + $0x10] sm:$0xff] }
   0x3   :  { %199 = vmatprep.subr.mxu0 %v227_v0  ;;  %218 = vmatprep.mubr.msk.f32.mxu1 %vm228_vm0, %v227_v0  ;;  %v16_v7 = vld [vmem:[%s282_s1 + $0x8] sm:$0xff]  ;;  %v15_v8 = vld [vmem:[%s282_s1] sm:$0xff] }
   0x4   :  { %200 = vmatpush3.msra.mxu0 %v21_v2  ;;  %v14_v9 = vld [vmem:[%s283_s0] sm:$0x3] }
   0x5   :  { %201 = vmatprep.subr.mxu0 %v227_v0  ;;  %v98_v10 = vld [vmem:[%s284_s2] sm:$0xff] }
   0x6   :  { %202 = vmatpush3.msra.mxu0 %v20_v3  ;;  %217 = vmatpush3.msra.mxu1 %v98_v10 }
   0x7   :  { %203 = vmatprep.subr.mxu0 %v227_v0 }
   0x8   :  { %204 = vmatpush3.msra.mxu0 %v19_v4 }
   0x9   :  { %205 = vmatprep.subr.mxu0 %v227_v0 }
   0xa   :  { %206 = vmatpush3.msra.mxu0 %v18_v5 }
   0xb   :  { %207 = vmatprep.subr.mxu0 %v227_v0 }
   0xc   :  { %208 = vmatpush3.msra.mxu0 %v17_v6 }
   0xd   :  { %209 = vmatprep.subr.mxu0 %v227_v0 }
   0xe   :  { %210 = vmatpush3.msra.mxu0 %v16_v7 }
   0xf   :  { %211 = vmatprep.subr.mxu0 %v227_v0 }
  0x10   :  { %212 = vmatpush3.msra.mxu0 %v15_v8 }
  0x11   :  { %214 = vmatmul.mubr.msk.f32.vlgmr.msra.gmra.mxu0 %vm23_vm1, %v14_v9 }
  0xd1   :  { %v93_v11 = vpop.f32.mrf.mxu0 }
  0xd2   :  { %v97_v12 = vmax.f32 %v93_v11, 0.0 }
  0xd3   :  { %v215_v13 = vpop.f32.mrf.mxu0 }
  0xd4   :  { %219 = vmatmul.mubr.msk.f32.vlgmr.msra.gmra.mxu1 %vm99_vm2, %v97_v12 }
 0x194   :  { %v169_v14 = vpop.f32.mrf.mxu1 }
 0x195   :  { %v173_v15 = vsub.f32 0.0, %v169_v14 }
 0x196   :  { %v220_v16 = vpop.f32.mrf.mxu1 }
 0x197   :  { %v174_v17 = vmul.f32 1.442695, %v173_v15 }
 0x199   :  { %223 = vpow2.f32 %v174_v17 }
 0x1a6   :  { %v224_v18 = vpop.eup %223 }
 0x1a7   :  { %v176_v19 = vadd.f32 1.0, %v224_v18 }
 0x1a9   :  { %225 = vrcp.f32 %v176_v19 }
 0x1b6   :  { %v226_v20 = vpop.eup %225 }
 0x1b7   :  { %179 = vst [vmem:[%s285_s3] sm:$0x3] %v226_v20 }

// kernel: osme_forward.3
= control target key start
LH: loop header
LB: loop body
LE: loop exit
PB: predicated region body
PF: predicated region fallthrough
CT: control target
= control target key end

     0   :  { %s4226_s12 = smov 0   ;;  %s4228_s13 = smov 0   ;;  %s4586_s0 = inlined_call_operand.vmem [shape: bf16[2,2,4096], index: 0, kind: input, shape index: {}]   ;;  %s4587_s1 = inlined_call_operand.vmem [shape: bf16[2,4096,128], index: 1, kind: input, shape index: {}]   ;;  %s4588_s2 = inlined_call_operand.vmem [shape: f32[2,1,128], index: 2, kind: input, shape index: {}]   ;;  %s4589_s3 = inlined_call_operand.vmem [shape: f32[2,2,128], index: 3, kind: output, shape index: {}]  }
   0x1   :  { %s4230_s14 = smov 0  }
   0x2 LB: > { %s25_s15 = sadd.s32 1, %s4199_s13  ;;  %p3279_p0 = scmp.ge.s32.totalorder %s4203_s14, 1  ;;  %s4203_s14 = sphi %s4230_s14, %s13_s14   ;;  %s4199_s13 = sphi %s4228_s13, %s4591_s13   ;;  %s4195_s12 = sphi %s4226_s12, %s4590_s12  }
   0x3   : > { %p27_p1 = scmp.ge.s32.totalorder %s25_s15, 2  ;;  %p180_p2 = scmp.lt.s32.totalorder %s4203_s14, 3 }
   0x5   : > { %s4593_s15 = smov (%p27_p1, %s25_s15), 0  ;;  %p181_p3 = pnand %p3279_p0, %p180_p2 }
   0x6   : > { %p219_p4 = scmp.lt.s32.totalorder (!%p181_p3), %s4195_s12, 1 }
   0x7   : > { %184 = sbr.rel (%p181_p3) target bundleno = 477 (0x1dd), region = 32 }
   0xc   : > { %s4595_s12 = smov (!%p219_p4, %s4195_s12), 1  ;;  %v4205_v22 = vmov 1966171168   ;;  %v782_v24 = vlaneseq }
   0xd   : > { %s3543_s16 = sshll.u32 %s4595_s12, 11  ;;  %v780_v23 = vunpack.c.l.s4 %v4205_v22  ;;  %s3280_s20 = sshll.u32 %s4595_s12, 5 }
   0xe   : > { %s4250_s19 = scalar_lea.vmem %s4587_s1, %s3543_s16  ;;  %v783_v30 = vshrl.u32 %v782_v24, 7  ;;  %s4286_s23 = scalar_lea.vmem %s4586_s0, %s3280_s20 }
   0xf   : > { %v3921_v0 = vld [vmem:[%s4250_s19 + $0x78] sm:$0xff]   ;;  %v3925_v4 = vld [vmem:[%s4250_s19 + $0x70] sm:$0xff]   ;;  %v3929_v8 = vld [vmem:[%s4250_s19 + $0x68] sm:$0xff]   ;;  %v781_v29 = vunpack.c.0.s8 %v780_v23  ;;  %s239_s26 = scalar_lea.vmem %s4588_s2, %s4595_s12  ;;  %s3283_s27 = sshll.u32 %s4595_s12, 1 }
  0x10   : > { %v3922_v1 = vld [vmem:[%s4250_s19 + $0xf8] sm:$0xff]   ;;  %3544 = vmatprep.subr.bf16.mxu0 %v3921_v0  ;;  %v3926_v5 = vld [vmem:[%s4250_s19 + $0xf0] sm:$0xff]   ;;  %v3930_v9 = vld [vmem:[%s4250_s19 + $0xe8] sm:$0xff]   ;;  %s4572_s30 = scalar_lea.vmem %s4589_s3, %s3283_s27 }
  0x11   : > { %v3923_v2 = vld [vmem:[%s4250_s19 + $0x38] sm:$0xff]   ;;  %3566 = vmatprep.subr.bf16.mxu1 %v3922_v1  ;;  %v3927_v6 = vld [vmem:[%s4250_s19 + $0x30] sm:$0xff]   ;;  %v3931_v10 = vld [vmem:[%s4250_s19 + $0x28] sm:$0xff]   ;;  %v4288_v35 = vsub.s32 %v781_v29, %v783_v30 }
  0x12   : > { %v3924_v3 = vld [vmem:[%s4250_s19 + $0xb8] sm:$0xff]   ;;  %3545 = vmatpush3.bf16.msra.mxu0 %v3923_v2  ;;  %v3928_v7 = vld [vmem:[%s4250_s19 + $0xb0] sm:$0xff]   ;;  %v3932_v11 = vld [vmem:[%s4250_s19 + $0xa8] sm:$0xff]  }
  0x13   : > { %3567 = vmatpush3.bf16.msra.mxu1 %v3924_v3  ;;  %3546 = vmatprep.subr.bf16.mxu0 %v3925_v4  ;;  %v3933_v12 = vld [vmem:[%s4250_s19 + $0x60] sm:$0xff]   ;;  %v3937_v16 = vld [vmem:[%s4250_s19 + $0x58] sm:$0xff]   ;;  %v3941_v20 = vld [vmem:[%s4250_s19 + $0x50] sm:$0xff]  }
  0x14   : > { %3568 = vmatprep.subr.bf16.mxu1 %v3926_v5  ;;  %v3934_v13 = vld [vmem:[%s4250_s19 + $0xe0] sm:$0xff]   ;;  %v3938_v17 = vld [vmem:[%s4250_s19 + $0xd8] sm:$0xff]   ;;  %v3942_v21 = vld [vmem:[%s4250_s19 + $0xd0] sm:$0xff]  }
  0x15   : > { %v3935_v14 = vld [vmem:[%s4250_s19 + $0x20] sm:$0xff]   ;;  %v3939_v18 = vld [vmem:[%s4250_s19 + $0x18] sm:$0xff]   ;;  %v3943_v25 = vld [vmem:[%s4250_s19 + $0x10] sm:$0xff]  }
  0x16   : > { %3547 = vmatpush3.bf16.msra.mxu0 %v3927_v6  ;;  %v3936_v15 = vld [vmem:[%s4250_s19 + $0xa0] sm:$0xff]   ;;  %v3940_v19 = vld [vmem:[%s4250_s19 + $0x98] sm:$0xff]   ;;  %v3944_v26 = vld [vmem:[%s4250_s19 + $0x90] sm:$0xff]  }
  0x17   : > { %3569 = vmatpush3.bf16.msra.mxu1 %v3928_v7  ;;  %3548 = vmatprep.subr.bf16.mxu0 %v3929_v8  ;;  %v3945_v27 = vld [vmem:[%s4250_s19 + $0x48] sm:$0xff]   ;;  %v3949_v33 = vld [vmem:[%s4250_s19 + $0x40] sm:$0xff]   ;;  %v3954_v41 = vld [vmem:[%s4250_s19 + $0x178] sm:$0xff]  }
  0x18   : > { %3570 = vmatprep.subr.bf16.mxu1 %v3930_v9  ;;  %v3946_v28 = vld [vmem:[%s4250_s19 + $0xc8] sm:$0xff]   ;;  %v3950_v34 = vld [vmem:[%s4250_s19 + $0xc0] sm:$0xff]   ;;  %v3955_v42 = vld [vmem:[%s4250_s19 + $0x1f8] sm:$0xff]  }
  0x19   : > { %v3947_v31 = vld [vmem:[%s4250_s19 + $0x8] sm:$0xff]   ;;  %v3951_v36 = vld [vmem:[%s4250_s19] sm:$0xff]   ;;  %v3956_v46 = vld [vmem:[%s4250_s19 + $0x138] sm:$0xff]  }
  0x1a   : > { %3549 = vmatpush3.bf16.msra.mxu0 %v3931_v10  ;;  %v3948_v32 = vld [vmem:[%s4250_s19 + $0x88] sm:$0xff]   ;;  %v3952_v37 = vld [vmem:[%s4250_s19 + $0x80] sm:$0xff]   ;;  %v3957_v48 = vld [vmem:[%s4250_s19 + $0x1b8] sm:$0xff]  }
  0x1b   : > { %3571 = vmatpush3.bf16.msra.mxu1 %v3932_v11  ;;  %3550 = vmatprep.subr.bf16.mxu0 %v3933_v12  ;;  %v258_v38 = vld [vmem:[%s4286_s23] sm:$0xff]  ;;  %v3958_v51 = vld [vmem:[%s4250_s19 + $0x170] sm:$0xff]   ;;  %v3962_v58 = vld [vmem:[%s4250_s19 + $0x168] sm:$0xff]  }
  0x1c   : > { %3572 = vmatprep.subr.bf16.mxu1 %v3934_v13  ;;  %v778_v39 = vcombine.high %v258_v38, %v258_v38  ;;  %v785_v40 = vrot.slane %v258_v38, %v4288_v35  ;;  %v3959_v53 = vld [vmem:[%s4250_s19 + $0x1f0] sm:$0xff]   ;;  %v3963_v59 = vld [vmem:[%s4250_s19 + $0x1e8] sm:$0xff]   ;;  %v3966_v62 = vld [vmem:[%s4250_s19 + $0x160] sm:$0xff]  }
  0x1d   : > { %v3960_v55 = vld [vmem:[%s4250_s19 + $0x130] sm:$0xff]   ;;  %v3964_v60 = vld [vmem:[%s4250_s19 + $0x128] sm:$0xff]   ;;  %v3967_v63 = vld [vmem:[%s4250_s19 + $0x1e0] sm:$0xff]  }
  0x1e   : > { %3551 = vmatpush3.bf16.msra.mxu0 %v3935_v14  ;;  %v793_v43 = vcombine.high %v785_v40, %v785_v40  ;;  %v801_v44 = vrot.slane %v785_v40, %v4288_v35  ;;  %v4298_v45 = vrot.slane %v778_v39, %v4288_v35  ;;  %v3961_v56 = vld [vmem:[%s4250_s19 + $0x1b0] sm:$0xff]   ;;  %v3965_v61 = vld [vmem:[%s4250_s19 + $0x1a8] sm:$0xff]   ;;  %v3968_v0 = vld [vmem:[%s4250_s19 + $0x120] sm:$0xff]  }
  0x1f   : > { %3573 = vmatpush3.bf16.msra.mxu1 %v3936_v15  ;;  %3552 = vmatprep.subr.bf16.mxu0 %v3937_v16  ;;  %v3969_v1 = vld [vmem:[%s4250_s19 + $0x1a0] sm:$0xff]   ;;  %v3970_v2 = vld [vmem:[%s4250_s19 + $0x158] sm:$0xff]   ;;  %v3974_v6 = vld [vmem:[%s4250_s19 + $0x150] sm:$0xff]  }
  0x20   : > { %3574 = vmatprep.subr.bf16.mxu1 %v3938_v17  ;;  %v815_v47 = vrot.slane %v793_v43, %v4288_v35  ;;  %v794_v49 = vcombine.high %v4298_v45, %v4298_v45  ;;  %v823_v50 = vcombine.high %v801_v44, %v801_v44  ;;  %v3971_v3 = vld [vmem:[%s4250_s19 + $0x1d8] sm:$0xff]   ;;  %v3975_v7 = vld [vmem:[%s4250_s19 + $0x1d0] sm:$0xff]   ;;  %v3978_v10 = vld [vmem:[%s4250_s19 + $0x148] sm:$0xff]  }
  0x21   : > { %v3972_v4 = vld [vmem:[%s4250_s19 + $0x118] sm:$0xff]   ;;  %v3976_v8 = vld [vmem:[%s4250_s19 + $0x110] sm:$0xff]   ;;  %v3979_v11 = vld [vmem:[%s4250_s19 + $0x1c8] sm:$0xff]  }
  0x22   : > { %3553 = vmatpush3.bf16.msra.mxu0 %v3939_v18  ;;  %2574 = vmatprep.mubr.bf16.mxu0 %v815_v47  ;;  %v825_v52 = vcombine.high %v815_v47, %v815_v47  ;;  %v822_v54 = vrot.slane %v794_v49, %v4288_v35  ;;  %v3973_v5 = vld [vmem:[%s4250_s19 + $0x198] sm:$0xff]   ;;  %v3977_v9 = vld [vmem:[%s4250_s19 + $0x190] sm:$0xff]   ;;  %v3980_v12 = vld [vmem:[%s4250_s19 + $0x108] sm:$0xff]   ;;  %v808_v18 = vrot.slane %v4298_v45, %v4288_v35 }
  0x23   : > { %3575 = vmatpush3.bf16.msra.mxu1 %v3940_v19  ;;  %3554 = vmatprep.subr.bf16.mxu0 %v3941_v20  ;;  %v3981_v13 = vld [vmem:[%s4250_s19 + $0x188] sm:$0xff]   ;;  %v3982_v14 = vld [vmem:[%s4250_s19 + $0x140] sm:$0xff]   ;;  %v3986_v19 = vld [vmem:[%s4250_s19 + $0x278] sm:$0xff]  }
  0x24   : > { %3576 = vmatprep.subr.bf16.mxu1 %v3942_v21  ;;  %2614 = vmatprep.mubr.bf16.mxu1 %v825_v52  ;;  %v826_v57 = vcombine.high %v822_v54, %v822_v54  ;;  %v3983_v15 = vld [vmem:[%s4250_s19 + $0x1c0] sm:$0xff]   ;;  %v3987_v20 = vld [vmem:[%s4250_s19 + $0x2f8] sm:$0xff]   ;;  %v824_v23 = vcombine.high %v808_v18, %v808_v18  ;;  %v3990_v24 = vld [vmem:[%s4250_s19 + $0x270] sm:$0xff]  }
  0x25   : > { %v3984_v16 = vld [vmem:[%s4250_s19 + $0x100] sm:$0xff]   ;;  %v3988_v21 = vld [vmem:[%s4250_s19 + $0x238] sm:$0xff]   ;;  %v3995_v29 = vld [vmem:[%s4250_s19 + $0x2e8] sm:$0xff]  }
  0x26   : > { %3555 = vmatpush3.bf16.msra.mxu0 %v3943_v25  ;;  %v3985_v17 = vld [vmem:[%s4250_s19 + $0x180] sm:$0xff]   ;;  %v3989_v22 = vld [vmem:[%s4250_s19 + $0x2b8] sm:$0xff]   ;;  %v3991_v25 = vld [vmem:[%s4250_s19 + $0x2f0] sm:$0xff]  }
  0x27   : > { %3577 = vmatpush3.bf16.msra.mxu1 %v3944_v26  ;;  %3556 = vmatprep.subr.bf16.mxu0 %v3945_v27  ;;  %v3992_v26 = vld [vmem:[%s4250_s19 + $0x230] sm:$0xff]   ;;  %v3996_v30 = vld [vmem:[%s4250_s19 + $0x228] sm:$0xff]   ;;  %v4003_v38 = vld [vmem:[%s4250_s19 + $0x2d8] sm:$0xff]  }
  0x28   : > { %3578 = vmatprep.subr.bf16.mxu1 %v3946_v28  ;;  %v3993_v27 = vld [vmem:[%s4250_s19 + $0x2b0] sm:$0xff]   ;;  %v3994_v28 = vld [vmem:[%s4250_s19 + $0x268] sm:$0xff]   ;;  %v4004_v39 = vld [vmem:[%s4250_s19 + $0x218] sm:$0xff]  }
  0x29   : > { %v4005_v40 = vld [vmem:[%s4250_s19 + $0x298] sm:$0xff]   ;;  %v4008_v43 = vld [vmem:[%s4250_s19 + $0x210] sm:$0xff]   ;;  %v4010_v45 = vld [vmem:[%s4250_s19 + $0x248] sm:$0xff]  }
  0x2a   : > { %3557 = vmatpush3.bf16.msra.mxu0 %v3947_v31  ;;  %v3997_v31 = vld [vmem:[%s4250_s19 + $0x2a8] sm:$0xff]   ;;  %v4014_v49 = vld [vmem:[%s4250_s19 + $0x240] sm:$0xff]  }
  0x2b   : > { %3579 = vmatpush3.bf16.msra.mxu1 %v3948_v32  ;;  %3558 = vmatprep.subr.bf16.mxu0 %v3949_v33  ;;  %v3998_v32 = vld [vmem:[%s4250_s19 + $0x260] sm:$0xff]   ;;  %v4012_v47 = vld [vmem:[%s4250_s19 + $0x208] sm:$0xff]  }
  0x2c   : > { %3580 = vmatprep.subr.bf16.mxu1 %v3950_v34  ;;  %v3999_v33 = vld [vmem:[%s4250_s19 + $0x2e0] sm:$0xff]   ;;  %v259_v52 = vld [vmem:[%s4286_s23 + $0x8] sm:$0xff] }
  0x2d   : > { %v4000_v34 = vld [vmem:[%s4250_s19 + $0x220] sm:$0xff]  }
  0x2e   : > { %3559 = vmatpush3.bf16.msra.mxu0 %v3951_v36  ;;  %v4001_v36 = vld [vmem:[%s4250_s19 + $0x2a0] sm:$0xff]  }
  0x2f   : > { %3581 = vmatpush3.bf16.msra.mxu1 %v3952_v37  ;;  %3588 = vmatprep.subr.bf16.mxu0 %v3954_v41  ;;  %v4002_v37 = vld [vmem:[%s4250_s19 + $0x258] sm:$0xff]   ;;  %v4006_v41 = vld [vmem:[%s4250_s19 + $0x250] sm:$0xff]  }
  0x30   : > { %3610 = vmatprep.subr.bf16.mxu1 %v3955_v42  ;;  %v4007_v42 = vld [vmem:[%s4250_s19 + $0x2d0] sm:$0xff]  }
  0x31   : > { %2575 = vmatmul.mubr.bf16.vlgmr.msra.gmra.mxu0 %v801_v44  ;;  %v4009_v44 = vld [vmem:[%s4250_s19 + $0x290] sm:$0xff]  }
  0x32   : > { %3589 = vmatpush3.bf16.msra.mxu0 %v3956_v46  ;;  %2615 = vmatmul.mubr.bf16.vlgmr.msra.gmra.mxu1 %v823_v50  ;;  %v4011_v46 = vld [vmem:[%s4250_s19 + $0x2c8] sm:$0xff]   ;;  %v4015_v50 = vld [vmem:[%s4250_s19 + $0x2c0] sm:$0xff]  }
  0x33   : > { %3590 = vmatprep.subr.bf16.mxu0 %v3958_v51  ;;  %3611 = vmatpush3.bf16.msra.mxu1 %v3957_v48  ;;  %v4013_v48 = vld [vmem:[%s4250_s19 + $0x288] sm:$0xff]   ;;  %v4016_v51 = vld [vmem:[%s4250_s19 + $0x200] sm:$0xff]  }
  0x34   : > { %2654 = vmatprep.mubr.bf16.mxu0 %v822_v54  ;;  %3612 = vmatprep.subr.bf16.mxu1 %v3959_v53  ;;  %v4017_v53 = vld [vmem:[%s4250_s19 + $0x280] sm:$0xff]   ;;  %v834_v54 = vrot.slane %v259_v52, %v4288_v35 }
  0x35   : > { %2694 = vmatprep.mubr.bf16.mxu1 %v826_v57 }
  0x36   : > { %3591 = vmatpush3.bf16.msra.mxu0 %v3960_v55  ;;  %v827_v55 = vcombine.high %v259_v52, %v259_v52  ;;  %v842_v57 = vcombine.high %v834_v54, %v834_v54  ;;  %v4067_v52 = vld [vmem:[%s4250_s19 + $0x458] sm:$0xff]  }
  0x37   : > { %3592 = vmatprep.subr.bf16.mxu0 %v3962_v58  ;;  %3613 = vmatpush3.bf16.msra.mxu1 %v3961_v56  ;;  %v4018_v56 = vld [vmem:[%s4250_s19 + $0x378] sm:$0xff]   ;;  %v850_v58 = vrot.slane %v834_v54, %v4288_v35 }
  0x38   : > { %3614 = vmatprep.subr.bf16.mxu1 %v3963_v59  ;;  %v4019_v59 = vld [vmem:[%s4250_s19 + $0x3f8] sm:$0xff]  }
  0x39   : > { %v4069_v54 = vld [vmem:[%s4250_s19 + $0x418] sm:$0xff]  }
  0x3a   : > { %3593 = vmatpush3.bf16.msra.mxu0 %v3964_v60  ;;  %v4374_v60 = vrot.slane %v827_v55, %v4288_v35  ;;  %v4070_v55 = vld [vmem:[%s4250_s19 + $0x498] sm:$0xff]  }
  0x3b   : > { %3594 = vmatprep.subr.bf16.mxu0 %v3966_v62  ;;  %3615 = vmatpush3.bf16.msra.mxu1 %v3965_v61  ;;  %v4020_v61 = vld [vmem:[%s4250_s19 + $0x338] sm:$0xff]   ;;  %v864_v62 = vrot.slane %v842_v57, %v4288_v35  ;;  %v4072_v57 = vld [vmem:[%s4250_s19 + $0x4d0] sm:$0xff]  }
  0x3c   : > { %3616 = vmatprep.subr.bf16.mxu1 %v3967_v63  ;;  %v4021_v63 = vld [vmem:[%s4250_s19 + $0x3b8] sm:$0xff]  }
  0x3e   : > { %3595 = vmatpush3.bf16.msra.mxu0 %v3968_v0  ;;  %v843_v0 = vcombine.high %v4374_v60, %v4374_v60 }
  0x3f   : > { %3596 = vmatprep.subr.bf16.mxu0 %v3970_v2  ;;  %3617 = vmatpush3.bf16.msra.mxu1 %v3969_v1  ;;  %v872_v1 = vcombine.high %v850_v58, %v850_v58  ;;  %v4022_v2 = vld [vmem:[%s4250_s19 + $0x370] sm:$0xff]  }
  0x40   : > { %3618 = vmatprep.subr.bf16.mxu1 %v3971_v3  ;;  %v874_v3 = vcombine.high %v864_v62, %v864_v62 }
  0x42   : > { %3597 = vmatpush3.bf16.msra.mxu0 %v3972_v4  ;;  %v4023_v4 = vld [vmem:[%s4250_s19 + $0x3f0] sm:$0xff]  }
  0x43   : > { %3598 = vmatprep.subr.bf16.mxu0 %v3974_v6  ;;  %3619 = vmatpush3.bf16.msra.mxu1 %v3973_v5  ;;  %v871_v5 = vrot.slane %v843_v0, %v4288_v35  ;;  %v4024_v6 = vld [vmem:[%s4250_s19 + $0x330] sm:$0xff]   ;;  %v4079_v0 = vld [vmem:[%s4250_s19 + $0x440] sm:$0xff]  }
  0x44   : > { %3620 = vmatprep.subr.bf16.mxu1 %v3975_v7  ;;  %v4025_v7 = vld [vmem:[%s4250_s19 + $0x3b0] sm:$0xff]  }
  0x46   : > { %3599 = vmatpush3.bf16.msra.mxu0 %v3976_v8  ;;  %v875_v8 = vcombine.high %v871_v5, %v871_v5 }
  0x47   : > { %3600 = vmatprep.subr.bf16.mxu0 %v3978_v10  ;;  %3621 = vmatpush3.bf16.msra.mxu1 %v3977_v9  ;;  %v4026_v9 = vld [vmem:[%s4250_s19 + $0x368] sm:$0xff]  }
  0x48   : > { %3622 = vmatprep.subr.bf16.mxu1 %v3979_v11  ;;  %v4027_v10 = vld [vmem:[%s4250_s19 + $0x3e8] sm:$0xff]  }
  0x49   : > { %v4028_v11 = vld [vmem:[%s4250_s19 + $0x328] sm:$0xff]  }
  0x4a   : > { %3601 = vmatpush3.bf16.msra.mxu0 %v3980_v12  ;;  %v4029_v12 = vld [vmem:[%s4250_s19 + $0x3a8] sm:$0xff]  }
  0x4b   : > { %3602 = vmatprep.subr.bf16.mxu0 %v3982_v14  ;;  %3623 = vmatpush3.bf16.msra.mxu1 %v3981_v13  ;;  %v4030_v13 = vld [vmem:[%s4250_s19 + $0x360] sm:$0xff]  }
  0x4c   : > { %3624 = vmatprep.subr.bf16.mxu1 %v3983_v15  ;;  %v4031_v14 = vld [vmem:[%s4250_s19 + $0x3e0] sm:$0xff]  }
  0x4d   : > { %v4032_v15 = vld [vmem:[%s4250_s19 + $0x320] sm:$0xff]  }
  0x4e   : > { %3603 = vmatpush3.bf16.msra.mxu0 %v3984_v16  ;;  %v4033_v16 = vld [vmem:[%s4250_s19 + $0x3a0] sm:$0xff]  }
  0x4f   : > { %3632 = vmatprep.subr.bf16.mxu0 %v3986_v19  ;;  %3625 = vmatpush3.bf16.msra.mxu1 %v3985_v17  ;;  %v4034_v17 = vld [vmem:[%s4250_s19 + $0x358] sm:$0xff]  }
  0x50   : > { %3654 = vmatprep.subr.bf16.mxu1 %v3987_v20  ;;  %v4036_v19 = vld [vmem:[%s4250_s19 + $0x318] sm:$0xff]  }
  0x51   : > { %2655 = vmatmul.mubr.bf16.vlgmr.msra.gmra.mxu0 %v808_v18  ;;  %v4035_v18 = vld [vmem:[%s4250_s19 + $0x3d8] sm:$0xff]  }
  0x52   : > { %3633 = vmatpush3.bf16.msra.mxu0 %v3988_v21  ;;  %2695 = vmatmul.mubr.bf16.vlgmr.msra.gmra.mxu1 %v824_v23  ;;  %v4037_v20 = vld [vmem:[%s4250_s19 + $0x398] sm:$0xff]   ;;  %v4038_v21 = vld [vmem:[%s4250_s19 + $0x350] sm:$0xff]  }
  0x53   : > { %3634 = vmatprep.subr.bf16.mxu0 %v3990_v24  ;;  %3655 = vmatpush3.bf16.msra.mxu1 %v3989_v22  ;;  %v4039_v22 = vld [vmem:[%s4250_s19 + $0x3d0] sm:$0xff]  }
  0x54   : > { %3656 = vmatprep.subr.bf16.mxu1 %v3991_v25  ;;  %2734 = vmatprep.mubr.bf16.mxu0 %v864_v62  ;;  %v4040_v23 = vld [vmem:[%s4250_s19 + $0x310] sm:$0xff]   ;;  %v4042_v25 = vld [vmem:[%s4250_s19 + $0x348] sm:$0xff]  }
  0x55   : > { %2774 = vmatprep.mubr.bf16.mxu1 %v874_v3  ;;  %v4041_v24 = vld [vmem:[%s4250_s19 + $0x390] sm:$0xff]   ;;  %v4077_v62 = vld [vmem:[%s4250_s19 + $0x408] sm:$0xff]  }
  0x56   : > { %3635 = vmatpush3.bf16.msra.mxu0 %v3992_v26  ;;  %v4043_v26 = vld [vmem:[%s4250_s19 + $0x3c8] sm:$0xff]   ;;  %v260_v3 = vld [vmem:[%s4286_s23 + $0x10] sm:$0xff] }
  0x57   : > { %3636 = vmatprep.subr.bf16.mxu0 %v3994_v28  ;;  %3657 = vmatpush3.bf16.msra.mxu1 %v3993_v27  ;;  %v4044_v27 = vld [vmem:[%s4250_s19 + $0x308] sm:$0xff]  }
  0x58   : > { %3658 = vmatprep.subr.bf16.mxu1 %v3995_v29  ;;  %v4045_v28 = vld [vmem:[%s4250_s19 + $0x388] sm:$0xff]   ;;  %v4046_v29 = vld [vmem:[%s4250_s19 + $0x340] sm:$0xff]  }
  0x5a   : > { %3637 = vmatpush3.bf16.msra.mxu0 %v3996_v30  ;;  %v4047_v30 = vld [vmem:[%s4250_s19 + $0x3c0] sm:$0xff]  }
  0x5b   : > { %3638 = vmatprep.subr.bf16.mxu0 %v3998_v32  ;;  %3659 = vmatpush3.bf16.msra.mxu1 %v3997_v31  ;;  %v4048_v31 = vld [vmem:[%s4250_s19 + $0x300] sm:$0xff]  }
  0x5c   : > { %3660 = vmatprep.subr.bf16.mxu1 %v3999_v33  ;;  %v4049_v32 = vld [vmem:[%s4250_s19 + $0x380] sm:$0xff]   ;;  %v857_v33 = vrot.slane %v4374_v60, %v4288_v35  ;;  %v4075_v60 = vld [vmem:[%s4250_s19 + $0x448] sm:$0xff]  }
  0x5e   : > { %3639 = vmatpush3.bf16.msra.mxu0 %v4000_v34  ;;  %v4051_v34 = vld [vmem:[%s4250_s19 + $0x478] sm:$0xff]  }
  0x5f   : > { %3640 = vmatprep.subr.bf16.mxu0 %v4002_v37  ;;  %3661 = vmatpush3.bf16.msra.mxu1 %v4001_v36  ;;  %v4052_v36 = vld [vmem:[%s4250_s19 + $0x4f8] sm:$0xff]  }
  0x60   : > { %3662 = vmatprep.subr.bf16.mxu1 %v4003_v38  ;;  %v4053_v37 = vld [vmem:[%s4250_s19 + $0x438] sm:$0xff]  }
  0x61   : > { %v4054_v38 = vld [vmem:[%s4250_s19 + $0x4b8] sm:$0xff]  }
  0x62   : > { %3641 = vmatpush3.bf16.msra.mxu0 %v4004_v39  ;;  %v873_v39 = vcombine.high %v857_v33, %v857_v33 }
  0x63   : > { %3642 = vmatprep.subr.bf16.mxu0 %v4006_v41  ;;  %3663 = vmatpush3.bf16.msra.mxu1 %v4005_v40  ;;  %v4055_v40 = vld [vmem:[%s4250_s19 + $0x470] sm:$0xff]  }
  0x64   : > { %3664 = vmatprep.subr.bf16.mxu1 %v4007_v42  ;;  %v4056_v41 = vld [vmem:[%s4250_s19 + $0x4f0] sm:$0xff]  }
  0x65   : > { %v4057_v42 = vld [vmem:[%s4250_s19 + $0x430] sm:$0xff]  }
  0x66   : > { %3643 = vmatpush3.bf16.msra.mxu0 %v4008_v43  ;;  %v4058_v43 = vld [vmem:[%s4250_s19 + $0x4b0] sm:$0xff]  }
  0x67   : > { %3644 = vmatprep.subr.bf16.mxu0 %v4010_v45  ;;  %3665 = vmatpush3.bf16.msra.mxu1 %v4009_v44  ;;  %v4059_v44 = vld [vmem:[%s4250_s19 + $0x468] sm:$0xff]  }
  0x68   : > { %3666 = vmatprep.subr.bf16.mxu1 %v4011_v46  ;;  %v4060_v45 = vld [vmem:[%s4250_s19 + $0x4e8] sm:$0xff]  }
  0x69   : > { %v4061_v46 = vld [vmem:[%s4250_s19 + $0x428] sm:$0xff]  }
  0x6a   : > { %3645 = vmatpush3.bf16.msra.mxu0 %v4012_v47  ;;  %v4062_v47 = vld [vmem:[%s4250_s19 + $0x4a8] sm:$0xff]  }
  0x6b   : > { %3646 = vmatprep.subr.bf16.mxu0 %v4014_v49  ;;  %3667 = vmatpush3.bf16.msra.mxu1 %v4013_v48  ;;  %v4063_v48 = vld [vmem:[%s4250_s19 + $0x460] sm:$0xff]  }
  0x6c   : > { %3668 = vmatprep.subr.bf16.mxu1 %v4015_v50  ;;  %v4064_v49 = vld [vmem:[%s4250_s19 + $0x4e0] sm:$0xff]  }
  0x6d   : > { %v4065_v50 = vld [vmem:[%s4250_s19 + $0x420] sm:$0xff]  }
  0x6e   : > { %3647 = vmatpush3.bf16.msra.mxu0 %v4016_v51  ;;  %v4066_v51 = vld [vmem:[%s4250_s19 + $0x4a0] sm:$0xff]  }
  0x6f   : > { %3676 = vmatprep.subr.bf16.mxu0 %v4018_v56  ;;  %3669 = vmatpush3.bf16.msra.mxu1 %v4017_v53  ;;  %v4068_v53 = vld [vmem:[%s4250_s19 + $0x4d8] sm:$0xff]   ;;  %v4071_v56 = vld [vmem:[%s4250_s19 + $0x450] sm:$0xff]  }
  0x70   : > { %3698 = vmatprep.subr.bf16.mxu1 %v4019_v59  ;;  %v4074_v59 = vld [vmem:[%s4250_s19 + $0x490] sm:$0xff]  }
  0x71   : > { %2735 = vmatmul.mubr.bf16.vlgmr.msra.gmra.mxu0 %v850_v58  ;;  %v4073_v58 = vld [vmem:[%s4250_s19 + $0x410] sm:$0xff]  }
  0x72   : > { %3677 = vmatpush3.bf16.msra.mxu0 %v4020_v61  ;;  %2775 = vmatmul.mubr.bf16.vlgmr.msra.gmra.mxu1 %v872_v1  ;;  %v4076_v61 = vld [vmem:[%s4250_s19 + $0x4c8] sm:$0xff]   ;;  %v4080_v1 = vld [vmem:[%s4250_s19 + $0x4c0] sm:$0xff]  }
  0x73   : > { %3678 = vmatprep.subr.bf16.mxu0 %v4022_v2  ;;  %3699 = vmatpush3.bf16.msra.mxu1 %v4021_v63  ;;  %v4078_v63 = vld [vmem:[%s4250_s19 + $0x488] sm:$0xff]   ;;  %v4081_v2 = vld [vmem:[%s4250_s19 + $0x400] sm:$0xff]  }
  0x74   : > { %2814 = vmatprep.mubr.bf16.mxu0 %v871_v5  ;;  %3700 = vmatprep.subr.bf16.mxu1 %v4023_v4  ;;  %v4082_v4 = vld [vmem:[%s4250_s19 + $0x480] sm:$0xff]   ;;  %v883_v5 = vrot.slane %v260_v3, %v4288_v35 }
  0x75   : > { %2854 = vmatprep.mubr.bf16.mxu1 %v875_v8 }
  0x76   : > { %3679 = vmatpush3.bf16.msra.mxu0 %v4024_v6  ;;  %v876_v6 = vcombine.high %v260_v3, %v260_v3  ;;  %v891_v8 = vcombine.high %v883_v5, %v883_v5  ;;  %v4132_v3 = vld [vmem:[%s4250_s19 + $0x658] sm:$0xff]  }
  0x77   : > { %3680 = vmatprep.subr.bf16.mxu0 %v4026_v9  ;;  %3701 = vmatpush3.bf16.msra.mxu1 %v4025_v7  ;;  %v4083_v7 = vld [vmem:[%s4250_s19 + $0x578] sm:$0xff]   ;;  %v899_v9 = vrot.slane %v883_v5, %v4288_v35 }
  0x78   : > { %3702 = vmatprep.subr.bf16.mxu1 %v4027_v10  ;;  %v4084_v10 = vld [vmem:[%s4250_s19 + $0x5f8] sm:$0xff]  }
  0x79   : > { %v4134_v5 = vld [vmem:[%s4250_s19 + $0x618] sm:$0xff]  }
  0x7a   : > { %3681 = vmatpush3.bf16.msra.mxu0 %v4028_v11  ;;  %v4450_v11 = vrot.slane %v876_v6, %v4288_v35  ;;  %v4135_v6 = vld [vmem:[%s4250_s19 + $0x698] sm:$0xff]  }
  0x7b   : > { %3682 = vmatprep.subr.bf16.mxu0 %v4030_v13  ;;  %3703 = vmatpush3.bf16.msra.mxu1 %v4029_v12  ;;  %v4085_v12 = vld [vmem:[%s4250_s19 + $0x538] sm:$0xff]   ;;  %v913_v13 = vrot.slane %v891_v8, %v4288_v35  ;;  %v4137_v8 = vld [vmem:[%s4250_s19 + $0x6d0] sm:$0xff]  }
  0x7c   : > { %3704 = vmatprep.subr.bf16.mxu1 %v4031_v14  ;;  %v4086_v14 = vld [vmem:[%s4250_s19 + $0x5b8] sm:$0xff]  }
  0x7e   : > { %3683 = vmatpush3.bf16.msra.mxu0 %v4032_v15  ;;  %v892_v15 = vcombine.high %v4450_v11, %v4450_v11 }
  0x7f   : > { %3684 = vmatprep.subr.bf16.mxu0 %v4034_v17  ;;  %3705 = vmatpush3.bf16.msra.mxu1 %v4033_v16  ;;  %v921_v16 = vcombine.high %v899_v9, %v899_v9  ;;  %v4087_v17 = vld [vmem:[%s4250_s19 + $0x570] sm:$0xff]  }
  0x80   : > { %3706 = vmatprep.subr.bf16.mxu1 %v4035_v18  ;;  %v923_v18 = vcombine.high %v913_v13, %v913_v13 }
  0x82   : > { %3685 = vmatpush3.bf16.msra.mxu0 %v4036_v19  ;;  %v4088_v19 = vld [vmem:[%s4250_s19 + $0x5f0] sm:$0xff]  }
  0x83   : > { %3686 = vmatprep.subr.bf16.mxu0 %v4038_v21  ;;  %3707 = vmatpush3.bf16.msra.mxu1 %v4037_v20  ;;  %v920_v20 = vrot.slane %v892_v15, %v4288_v35  ;;  %v4089_v21 = vld [vmem:[%s4250_s19 + $0x530] sm:$0xff]   ;;  %v4144_v15 = vld [vmem:[%s4250_s19 + $0x640] sm:$0xff]  }
  0x84   : > { %3708 = vmatprep.subr.bf16.mxu1 %v4039_v22  ;;  %v4090_v22 = vld [vmem:[%s4250_s19 + $0x5b0] sm:$0xff]  }
  0x86   : > { %3687 = vmatpush3.bf16.msra.mxu0 %v4040_v23  ;;  %v924_v23 = vcombine.high %v920_v20, %v920_v20 }
  0x87   : > { %3688 = vmatprep.subr.bf16.mxu0 %v4042_v25  ;;  %3709 = vmatpush3.bf16.msra.mxu1 %v4041_v24  ;;  %v4091_v24 = vld [vmem:[%s4250_s19 + $0x568] sm:$0xff]  }
  0x88   : > { %3710 = vmatprep.subr.bf16.mxu1 %v4043_v26  ;;  %v4092_v25 = vld [vmem:[%s4250_s19 + $0x5e8] sm:$0xff]  }
  0x89   : > { %v4093_v26 = vld [vmem:[%s4250_s19 + $0x528] sm:$0xff]  }
  0x8a   : > { %3689 = vmatpush3.bf16.msra.mxu0 %v4044_v27  ;;  %v4094_v27 = vld [vmem:[%s4250_s19 + $0x5a8] sm:$0xff]  }
  0x8b   : > { %3690 = vmatprep.subr.bf16.mxu0 %v4046_v29  ;;  %3711 = vmatpush3.bf16.msra.mxu1 %v4045_v28  ;;  %v4095_v28 = vld [vmem:[%s4250_s19 + $0x560] sm:$0xff]  }
  0x8c   : > { %3712 = vmatprep.subr.bf16.mxu1 %v4047_v30  ;;  %v4096_v29 = vld [vmem:[%s4250_s19 + $0x5e0] sm:$0xff]  }
  0x8d   : > { %v4097_v30 = vld [vmem:[%s4250_s19 + $0x520] sm:$0xff]  }
  0x8e   : > { %3691 = vmatpush3.bf16.msra.mxu0 %v4048_v31  ;;  %v4098_v31 = vld [vmem:[%s4250_s19 + $0x5a0] sm:$0xff]  }
  0x8f   : > { %3720 = vmatprep.subr.bf16.mxu0 %v4051_v34  ;;  %3713 = vmatpush3.bf16.msra.mxu1 %v4049_v32  ;;  %v4099_v32 = vld [vmem:[%s4250_s19 + $0x558] sm:$0xff]  }
  0x90   : > { %3742 = vmatprep.subr.bf16.mxu1 %v4052_v36  ;;  %v4101_v34 = vld [vmem:[%s4250_s19 + $0x518] sm:$0xff]  }
  0x91   : > { %2815 = vmatmul.mubr.bf16.vlgmr.msra.gmra.mxu0 %v857_v33  ;;  %v4100_v33 = vld [vmem:[%s4250_s19 + $0x5d8] sm:$0xff]  }
  0x92   : > { %3721 = vmatpush3.bf16.msra.mxu0 %v4053_v37  ;;  %2855 = vmatmul.mubr.bf16.vlgmr.msra.gmra.mxu1 %v873_v39  ;;  %v4102_v36 = vld [vmem:[%s4250_s19 + $0x598] sm:$0xff]   ;;  %v4103_v37 = vld [vmem:[%s4250_s19 + $0x550] sm:$0xff]  }
  0x93   : > { %3722 = vmatprep.subr.bf16.mxu0 %v4055_v40  ;;  %3743 = vmatpush3.bf16.msra.mxu1 %v4054_v38  ;;  %v4104_v38 = vld [vmem:[%s4250_s19 + $0x5d0] sm:$0xff]  }
  0x94   : > { %3744 = vmatprep.subr.bf16.mxu1 %v4056_v41  ;;  %2894 = vmatprep.mubr.bf16.mxu0 %v913_v13  ;;  %v4105_v39 = vld [vmem:[%s4250_s19 + $0x510] sm:$0xff]   ;;  %v4107_v41 = vld [vmem:[%s4250_s19 + $0x548] sm:$0xff]  }
  0x95   : > { %2934 = vmatprep.mubr.bf16.mxu1 %v923_v18  ;;  %v4106_v40 = vld [vmem:[%s4250_s19 + $0x590] sm:$0xff]   ;;  %v4142_v13 = vld [vmem:[%s4250_s19 + $0x608] sm:$0xff]   ;;  %v261_v18 = vld [vmem:[%s4286_s23 + $0x18] sm:$0xff] }
  0x96   : > { %3723 = vmatpush3.bf16.msra.mxu0 %v4057_v42  ;;  %v4108_v42 = vld [vmem:[%s4250_s19 + $0x5c8] sm:$0xff]  }
  0x97   : > { %3724 = vmatprep.subr.bf16.mxu0 %v4059_v44  ;;  %3745 = vmatpush3.bf16.msra.mxu1 %v4058_v43  ;;  %v4109_v43 = vld [vmem:[%s4250_s19 + $0x508] sm:$0xff]  }
  0x98   : > { %3746 = vmatprep.subr.bf16.mxu1 %v4060_v45  ;;  %v4110_v44 = vld [vmem:[%s4250_s19 + $0x588] sm:$0xff]   ;;  %v4111_v45 = vld [vmem:[%s4250_s19 + $0x540] sm:$0xff]  }
  0x9a   : > { %3725 = vmatpush3.bf16.msra.mxu0 %v4061_v46  ;;  %v4112_v46 = vld [vmem:[%s4250_s19 + $0x5c0] sm:$0xff]  }
  0x9b   : > { %3726 = vmatprep.subr.bf16.mxu0 %v4063_v48  ;;  %3747 = vmatpush3.bf16.msra.mxu1 %v4062_v47  ;;  %v4113_v47 = vld [vmem:[%s4250_s19 + $0x500] sm:$0xff]  }
  0x9c   : > { %3748 = vmatprep.subr.bf16.mxu1 %v4064_v49  ;;  %v4114_v48 = vld [vmem:[%s4250_s19 + $0x580] sm:$0xff]   ;;  %v906_v49 = vrot.slane %v4450_v11, %v4288_v35  ;;  %v4140_v11 = vld [vmem:[%s4250_s19 + $0x648] sm:$0xff]  }
  0x9e   : > { %3727 = vmatpush3.bf16.msra.mxu0 %v4065_v50  ;;  %v4116_v50 = vld [vmem:[%s4250_s19 + $0x678] sm:$0xff]  }
  0x9f   : > { %3728 = vmatprep.subr.bf16.mxu0 %v4067_v52  ;;  %3749 = vmatpush3.bf16.msra.mxu1 %v4066_v51  ;;  %v4117_v51 = vld [vmem:[%s4250_s19 + $0x6f8] sm:$0xff]  }
  0xa0   : > { %3750 = vmatprep.subr.bf16.mxu1 %v4068_v53  ;;  %v4118_v52 = vld [vmem:[%s4250_s19 + $0x638] sm:$0xff]  }
  0xa1   : > { %v4119_v53 = vld [vmem:[%s4250_s19 + $0x6b8] sm:$0xff]  }
  0xa2   : > { %3729 = vmatpush3.bf16.msra.mxu0 %v4069_v54  ;;  %v922_v54 = vcombine.high %v906_v49, %v906_v49 }
  0xa3   : > { %3730 = vmatprep.subr.bf16.mxu0 %v4071_v56  ;;  %3751 = vmatpush3.bf16.msra.mxu1 %v4070_v55  ;;  %v4120_v55 = vld [vmem:[%s4250_s19 + $0x670] sm:$0xff]  }
  0xa4   : > { %3752 = vmatprep.subr.bf16.mxu1 %v4072_v57  ;;  %v4121_v56 = vld [vmem:[%s4250_s19 + $0x6f0] sm:$0xff]  }
  0xa5   : > { %v4122_v57 = vld [vmem:[%s4250_s19 + $0x630] sm:$0xff]  }
  0xa6   : > { %3731 = vmatpush3.bf16.msra.mxu0 %v4073_v58  ;;  %v4123_v58 = vld [vmem:[%s4250_s19 + $0x6b0] sm:$0xff]  }
  0xa7   : > { %3732 = vmatprep.subr.bf16.mxu0 %v4075_v60  ;;  %3753 = vmatpush3.bf16.msra.mxu1 %v4074_v59  ;;  %v4124_v59 = vld [vmem:[%s4250_s19 + $0x668] sm:$0xff]  }
  0xa8   : > { %3754 = vmatprep.subr.bf16.mxu1 %v4076_v61  ;;  %v4125_v60 = vld [vmem:[%s4250_s19 + $0x6e8] sm:$0xff]  }
  0xa9   : > { %v4126_v61 = vld [vmem:[%s4250_s19 + $0x628] sm:$0xff]  }
  0xaa   : > { %3733 = vmatpush3.bf16.msra.mxu0 %v4077_v62  ;;  %v4127_v62 = vld [vmem:[%s4250_s19 + $0x6a8] sm:$0xff]  }
  0xab   : > { %3734 = vmatprep.subr.bf16.mxu0 %v4079_v0  ;;  %3755 = vmatpush3.bf16.msra.mxu1 %v4078_v63  ;;  %v4128_v63 = vld [vmem:[%s4250_s19 + $0x660] sm:$0xff]  }
  0xac   : > { %3756 = vmatprep.subr.bf16.mxu1 %v4080_v1  ;;  %v4129_v0 = vld [vmem:[%s4250_s19 + $0x6e0] sm:$0xff]  }
  0xad   : > { %v4130_v1 = vld [vmem:[%s4250_s19 + $0x620] sm:$0xff]  }
  0xae   : > { %3735 = vmatpush3.bf16.msra.mxu0 %v4081_v2  ;;  %v4131_v2 = vld [vmem:[%s4250_s19 + $0x6a0] sm:$0xff]  }
  0xaf   : > { %3764 = vmatprep.subr.bf16.mxu0 %v4083_v7  ;;  %3757 = vmatpush3.bf16.msra.mxu1 %v4082_v4  ;;  %v4133_v4 = vld [vmem:[%s4250_s19 + $0x6d8] sm:$0xff]   ;;  %v4136_v7 = vld [vmem:[%s4250_s19 + $0x650] sm:$0xff]  }
  0xb0   : > { %3786 = vmatprep.subr.bf16.mxu1 %v4084_v10  ;;  %v4139_v10 = vld [vmem:[%s4250_s19 + $0x690] sm:$0xff]  }
  0xb1   : > { %2895 = vmatmul.mubr.bf16.vlgmr.msra.gmra.mxu0 %v899_v9  ;;  %v4138_v9 = vld [vmem:[%s4250_s19 + $0x610] sm:$0xff]  }
  0xb2   : > { %3765 = vmatpush3.bf16.msra.mxu0 %v4085_v12  ;;  %2935 = vmatmul.mubr.bf16.vlgmr.msra.gmra.mxu1 %v921_v16  ;;  %v4141_v12 = vld [vmem:[%s4250_s19 + $0x6c8] sm:$0xff]   ;;  %v4145_v16 = vld [vmem:[%s4250_s19 + $0x6c0] sm:$0xff]  }
  0xb3   : > { %3766 = vmatprep.subr.bf16.mxu0 %v4087_v17  ;;  %3787 = vmatpush3.bf16.msra.mxu1 %v4086_v14  ;;  %v4143_v14 = vld [vmem:[%s4250_s19 + $0x688] sm:$0xff]   ;;  %v4146_v17 = vld [vmem:[%s4250_s19 + $0x600] sm:$0xff]  }
  0xb4   : > { %2974 = vmatprep.mubr.bf16.mxu0 %v920_v20  ;;  %3788 = vmatprep.subr.bf16.mxu1 %v4088_v19  ;;  %v932_v19 = vrot.slane %v261_v18, %v4288_v35  ;;  %v4148_v20 = vld [vmem:[%s4250_s19 + $0x778] sm:$0xff]  }
  0xb5   : > { %3014 = vmatprep.mubr.bf16.mxu1 %v924_v23 }
  0xb6   : > { %3767 = vmatpush3.bf16.msra.mxu0 %v4089_v21  ;;  %v925_v21 = vcombine.high %v261_v18, %v261_v18  ;;  %v940_v23 = vcombine.high %v932_v19, %v932_v19 }
  0xb7   : > { %3768 = vmatprep.subr.bf16.mxu0 %v4091_v24  ;;  %3789 = vmatpush3.bf16.msra.mxu1 %v4090_v22  ;;  %v4147_v22 = vld [vmem:[%s4250_s19 + $0x680] sm:$0xff]   ;;  %v948_v24 = vrot.slane %v932_v19, %v4288_v35 }
  0xb8   : > { %3790 = vmatprep.subr.bf16.mxu1 %v4092_v25  ;;  %v4149_v25 = vld [vmem:[%s4250_s19 + $0x7f8] sm:$0xff]  }
  0xba   : > { %3769 = vmatpush3.bf16.msra.mxu0 %v4093_v26  ;;  %v4526_v26 = vrot.slane %v925_v21, %v4288_v35 }
  0xbb   : > { %3770 = vmatprep.subr.bf16.mxu0 %v4095_v28  ;;  %3791 = vmatpush3.bf16.msra.mxu1 %v4094_v27  ;;  %v962_v27 = vrot.slane %v940_v23, %v4288_v35  ;;  %v4150_v28 = vld [vmem:[%s4250_s19 + $0x738] sm:$0xff]  }
  0xbc   : > { %3792 = vmatprep.subr.bf16.mxu1 %v4096_v29  ;;  %v941_v29 = vcombine.high %v4526_v26, %v4526_v26 }
  0xbe   : > { %3771 = vmatpush3.bf16.msra.mxu0 %v4097_v30  ;;  %v970_v30 = vcombine.high %v948_v24, %v948_v24 }
  0xbf   : > { %3772 = vmatprep.subr.bf16.mxu0 %v4099_v32  ;;  %3793 = vmatpush3.bf16.msra.mxu1 %v4098_v31  ;;  %v4152_v31 = vld [vmem:[%s4250_s19 + $0x770] sm:$0xff]   ;;  %v972_v32 = vcombine.high %v962_v27, %v962_v27 }
  0xc0   : > { %3794 = vmatprep.subr.bf16.mxu1 %v4100_v33 }
  0xc2   : > { %3773 = vmatpush3.bf16.msra.mxu0 %v4101_v34  ;;  %v4151_v34 = vld [vmem:[%s4250_s19 + $0x7b8] sm:$0xff]  }
  0xc3   : > { %3774 = vmatprep.subr.bf16.mxu0 %v4103_v37  ;;  %3795 = vmatpush3.bf16.msra.mxu1 %v4102_v36  ;;  %v969_v36 = vrot.slane %v941_v29, %v4288_v35  ;;  %v4153_v37 = vld [vmem:[%s4250_s19 + $0x7f0] sm:$0xff]  }
  0xc4   : > { %3796 = vmatprep.subr.bf16.mxu1 %v4104_v38 }
  0xc6   : > { %3775 = vmatpush3.bf16.msra.mxu0 %v4105_v39 }
  0xc7   : > { %3776 = vmatprep.subr.bf16.mxu0 %v4107_v41  ;;  %3797 = vmatpush3.bf16.msra.mxu1 %v4106_v40  ;;  %v4154_v40 = vld [vmem:[%s4250_s19 + $0x730] sm:$0xff]   ;;  %v973_v41 = vcombine.high %v969_v36, %v969_v36 }
  0xc8   : > { %3798 = vmatprep.subr.bf16.mxu1 %v4108_v42 }
  0xca   : > { %3777 = vmatpush3.bf16.msra.mxu0 %v4109_v43  ;;  %v4156_v43 = vld [vmem:[%s4250_s19 + $0x768] sm:$0xff]  }
  0xcb   : > { %3778 = vmatprep.subr.bf16.mxu0 %v4111_v45  ;;  %3799 = vmatpush3.bf16.msra.mxu1 %v4110_v44 }
  0xcc   : > { %3800 = vmatprep.subr.bf16.mxu1 %v4112_v46  ;;  %v4155_v46 = vld [vmem:[%s4250_s19 + $0x7b0] sm:$0xff]  }
  0xce   : > { %3779 = vmatpush3.bf16.msra.mxu0 %v4113_v47 }
  0xcf   : > { %3808 = vmatprep.subr.bf16.mxu0 %v4116_v50  ;;  %3801 = vmatpush3.bf16.msra.mxu1 %v4114_v48  ;;  %v4157_v48 = vld [vmem:[%s4250_s19 + $0x7e8] sm:$0xff]  }
  0xd0   : > { %3830 = vmatprep.subr.bf16.mxu1 %v4117_v51  ;;  %v4158_v51 = vld [vmem:[%s4250_s19 + $0x728] sm:$0xff]  }
  0xd1   : > { %2975 = vmatmul.mubr.bf16.vlgmr.msra.gmra.mxu0 %v906_v49 }
  0xd2   : > { %3809 = vmatpush3.bf16.msra.mxu0 %v4118_v52  ;;  %3015 = vmatmul.mubr.bf16.vlgmr.msra.gmra.mxu1 %v922_v54 }
  0xd3   : > { %3810 = vmatprep.subr.bf16.mxu0 %v4120_v55  ;;  %3831 = vmatpush3.bf16.msra.mxu1 %v4119_v53  ;;  %v4160_v53 = vld [vmem:[%s4250_s19 + $0x760] sm:$0xff]   ;;  %v4159_v55 = vld [vmem:[%s4250_s19 + $0x7a8] sm:$0xff]  }
  0xd4   : > { %3832 = vmatprep.subr.bf16.mxu1 %v4121_v56  ;;  %3054 = vmatprep.mubr.bf16.mxu0 %v962_v27  ;;  %v4161_v56 = vld [vmem:[%s4250_s19 + $0x7e0] sm:$0xff]  }
  0xd5   : > { %3094 = vmatprep.mubr.bf16.mxu1 %v972_v32 }
  0xd6   : > { %3811 = vmatpush3.bf16.msra.mxu0 %v4122_v57  ;;  %v4162_v57 = vld [vmem:[%s4250_s19 + $0x720] sm:$0xff]  }
  0xd7   : > { %3812 = vmatprep.subr.bf16.mxu0 %v4124_v59  ;;  %3833 = vmatpush3.bf16.msra.mxu1 %v4123_v58  ;;  %v4164_v58 = vld [vmem:[%s4250_s19 + $0x758] sm:$0xff]   ;;  %v4163_v59 = vld [vmem:[%s4250_s19 + $0x7a0] sm:$0xff]  }
  0xd8   : > { %3834 = vmatprep.subr.bf16.mxu1 %v4125_v60  ;;  %v4165_v60 = vld [vmem:[%s4250_s19 + $0x7d8] sm:$0xff]  }
  0xda   : > { %3813 = vmatpush3.bf16.msra.mxu0 %v4126_v61  ;;  %v4166_v61 = vld [vmem:[%s4250_s19 + $0x718] sm:$0xff]  }
  0xdb   : > { %3814 = vmatprep.subr.bf16.mxu0 %v4128_v63  ;;  %3835 = vmatpush3.bf16.msra.mxu1 %v4127_v62  ;;  %v4168_v62 = vld [vmem:[%s4250_s19 + $0x750] sm:$0xff]   ;;  %v4167_v63 = vld [vmem:[%s4250_s19 + $0x798] sm:$0xff]  }
  0xdc   : > { %3836 = vmatprep.subr.bf16.mxu1 %v4129_v0  ;;  %v4169_v0 = vld [vmem:[%s4250_s19 + $0x7d0] sm:$0xff]  }
  0xde   : > { %3815 = vmatpush3.bf16.msra.mxu0 %v4130_v1  ;;  %v4170_v1 = vld [vmem:[%s4250_s19 + $0x710] sm:$0xff]  }
  0xdf   : > { %3816 = vmatprep.subr.bf16.mxu0 %v4132_v3  ;;  %3837 = vmatpush3.bf16.msra.mxu1 %v4131_v2  ;;  %v4172_v2 = vld [vmem:[%s4250_s19 + $0x748] sm:$0xff]   ;;  %v4171_v3 = vld [vmem:[%s4250_s19 + $0x790] sm:$0xff]  }
  0xe0   : > { %3838 = vmatprep.subr.bf16.mxu1 %v4133_v4  ;;  %v4173_v4 = vld [vmem:[%s4250_s19 + $0x7c8] sm:$0xff]  }
  0xe2   : > { %3817 = vmatpush3.bf16.msra.mxu0 %v4134_v5  ;;  %v4174_v5 = vld [vmem:[%s4250_s19 + $0x708] sm:$0xff]  }
  0xe3   : > { %3818 = vmatprep.subr.bf16.mxu0 %v4136_v7  ;;  %3839 = vmatpush3.bf16.msra.mxu1 %v4135_v6  ;;  %v4176_v6 = vld [vmem:[%s4250_s19 + $0x740] sm:$0xff]   ;;  %v4175_v7 = vld [vmem:[%s4250_s19 + $0x788] sm:$0xff]  }
  0xe4   : > { %3840 = vmatprep.subr.bf16.mxu1 %v4137_v8  ;;  %v4177_v8 = vld [vmem:[%s4250_s19 + $0x7c0] sm:$0xff]  }
  0xe6   : > { %3819 = vmatpush3.bf16.msra.mxu0 %v4138_v9  ;;  %v4178_v9 = vld [vmem:[%s4250_s19 + $0x700] sm:$0xff]  }
  0xe7   : > { %3820 = vmatprep.subr.bf16.mxu0 %v4140_v11  ;;  %3841 = vmatpush3.bf16.msra.mxu1 %v4139_v10  ;;  %v955_v10 = vrot.slane %v4526_v26, %v4288_v35  ;;  %v4179_v11 = vld [vmem:[%s4250_s19 + $0x780] sm:$0xff]  }
  0xe8   : > { %3842 = vmatprep.subr.bf16.mxu1 %v4141_v12 }
  0xe9   : > { %v971_v12 = vcombine.high %v955_v10, %v955_v10 }
  0xea   : > { %3821 = vmatpush3.bf16.msra.mxu0 %v4142_v13 }
  0xeb   : > { %3822 = vmatprep.subr.bf16.mxu0 %v4144_v15  ;;  %3843 = vmatpush3.bf16.msra.mxu1 %v4143_v14 }
  0xec   : > { %3844 = vmatprep.subr.bf16.mxu1 %v4145_v16 }
  0xee   : > { %3823 = vmatpush3.bf16.msra.mxu0 %v4146_v17 }
  0xef   : > { %3852 = vmatprep.subr.bf16.mxu0 %v4148_v20  ;;  %3845 = vmatpush3.bf16.msra.mxu1 %v4147_v22 }
  0xf0   : > { %3874 = vmatprep.subr.bf16.mxu1 %v4149_v25 }
  0xf1   : > { %v3560_v33 = vpop.f32.mrf.mxu0  ;;  %3055 = vmatmul.mubr.bf16.vlgmr.msra.gmra.mxu0 %v948_v24 }
  0xf2   : > { %v3582_v38 = vpop.f32.mrf.mxu1  ;;  %3853 = vmatpush3.bf16.msra.mxu0 %v4150_v28  ;;  %3095 = vmatmul.mubr.bf16.vlgmr.msra.gmra.mxu1 %v970_v30 }
  0xf3   : > { %v3561_v39 = vpop.f32.mrf.mxu0  ;;  %3854 = vmatprep.subr.bf16.mxu0 %v4152_v31  ;;  %3875 = vmatpush3.bf16.msra.mxu1 %v4151_v34 }
  0xf4   : > { %v3562_v42 = vadd.f32 %v3561_v39, %v3560_v33  ;;  %v3583_v44 = vpop.f32.mrf.mxu1  ;;  %3134 = vmatprep.mubr.bf16.mxu0 %v969_v36  ;;  %3876 = vmatprep.subr.bf16.mxu1 %v4153_v37 }
  0xf5   : > { %v3563_v45 = vpop.f32.mrf.mxu0  ;;  %v3584_v47 = vadd.f32 %v3583_v44, %v3582_v38  ;;  %3174 = vmatprep.mubr.bf16.mxu1 %v973_v41  ;;  %v3284_v41 = vld [vmem:[%s239_s26] ss:$0 sm:$0xff] }
  0xf6   : > { %v3585_v49 = vpop.f32.mrf.mxu1  ;;  %3855 = vmatpush3.bf16.msra.mxu0 %v4154_v40  ;;  %256 = vst [vmem:[%s4572_s30] sm:$0x3] %v3284_v41 }
  0xf7   : > { %v3564_v50 = vpop.f32.mrf.mxu0  ;;  %v2617_v52 = vadd.f32 %v3584_v47, %v3562_v42  ;;  %3856 = vmatprep.subr.bf16.mxu0 %v4156_v43  ;;  %3877 = vmatpush3.bf16.msra.mxu1 %v4155_v46 }
  0xf8   : > { %v3586_v54 = vpop.f32.mrf.mxu1  ;;  %3878 = vmatprep.subr.bf16.mxu1 %v4157_v48 }
  0xfa   : > { %3857 = vmatpush3.bf16.msra.mxu0 %v4158_v51 }
  0xfb   : > { %3858 = vmatprep.subr.bf16.mxu0 %v4160_v53  ;;  %3879 = vmatpush3.bf16.msra.mxu1 %v4159_v55 }
  0xfc   : > { %3880 = vmatprep.subr.bf16.mxu1 %v4161_v56 }
  0xfe   : > { %3859 = vmatpush3.bf16.msra.mxu0 %v4162_v57 }
  0xff   : > { %3860 = vmatprep.subr.bf16.mxu0 %v4164_v58  ;;  %3881 = vmatpush3.bf16.msra.mxu1 %v4163_v59 }
 0x100   : > { %3882 = vmatprep.subr.bf16.mxu1 %v4165_v60 }
 0x102   : > { %3861 = vmatpush3.bf16.msra.mxu0 %v4166_v61 }
 0x103   : > { %3862 = vmatprep.subr.bf16.mxu0 %v4168_v62  ;;  %3883 = vmatpush3.bf16.msra.mxu1 %v4167_v63 }
 0x104   : > { %3884 = vmatprep.subr.bf16.mxu1 %v4169_v0 }
 0x106   : > { %3863 = vmatpush3.bf16.msra.mxu0 %v4170_v1 }
 0x107   : > { %3864 = vmatprep.subr.bf16.mxu0 %v4172_v2  ;;  %3885 = vmatpush3.bf16.msra.mxu1 %v4171_v3 }
 0x108   : > { %3886 = vmatprep.subr.bf16.mxu1 %v4173_v4 }
 0x10a   : > { %3865 = vmatpush3.bf16.msra.mxu0 %v4174_v5 }
 0x10b   : > { %3866 = vmatprep.subr.bf16.mxu0 %v4176_v6  ;;  %3887 = vmatpush3.bf16.msra.mxu1 %v4175_v7 }
 0x10c   : > { %3888 = vmatprep.subr.bf16.mxu1 %v4177_v8 }
 0x10e   : > { %3867 = vmatpush3.bf16.msra.mxu0 %v4178_v9 }
 0x10f   : > { %3889 = vmatpush3.bf16.msra.mxu1 %v4179_v11 }
 0x111   : > { %v3604_v13 = vpop.f32.mrf.mxu0  ;;  %3135 = vmatmul.mubr.bf16.vlgmr.msra.gmra.mxu0 %v955_v10 }
 0x112   : > { %v3626_v14 = vpop.f32.mrf.mxu1  ;;  %3175 = vmatmul.mubr.bf16.vlgmr.msra.gmra.mxu1 %v971_v12 }
 0x113   : > { %v3605_v15 = vpop.f32.mrf.mxu0 }
 0x114   : > { %v3606_v16 = vadd.f32 %v3605_v15, %v3604_v13  ;;  %v3627_v17 = vpop.f32.mrf.mxu1 }
 0x115   : > { %v3607_v18 = vpop.f32.mrf.mxu0  ;;  %v3628_v20 = vadd.f32 %v3627_v17, %v3626_v14 }
 0x116   : > { %v2657_v19 = vadd.f32 %v3606_v16, %v2617_v52  ;;  %v3629_v21 = vpop.f32.mrf.mxu1 }
 0x117   : > { %v3608_v22 = vpop.f32.mrf.mxu0 }
 0x118   : > { %v2697_v23 = vadd.f32 %v3628_v20, %v2657_v19  ;;  %v3630_v35 = vpop.f32.mrf.mxu1 }
 0x131   : > { %v3648_v24 = vpop.f32.mrf.mxu0 }
 0x132   : > { %v3670_v25 = vpop.f32.mrf.mxu1 }
 0x133   : > { %v3649_v26 = vpop.f32.mrf.mxu0 }
 0x134   : > { %v3650_v27 = vadd.f32 %v3649_v26, %v3648_v24  ;;  %v3671_v28 = vpop.f32.mrf.mxu1 }
 0x135   : > { %v3651_v29 = vpop.f32.mrf.mxu0  ;;  %v3672_v31 = vadd.f32 %v3671_v28, %v3670_v25 }
 0x136   : > { %v2737_v30 = vadd.f32 %v3650_v27, %v2697_v23  ;;  %v3673_v32 = vpop.f32.mrf.mxu1  ;;  %v257_v29 = vld [vmem:[%s4572_s30] sm:$0x3] }
 0x137   : > { %v3652_v33 = vpop.f32.mrf.mxu0 }
 0x138   : > { %v2777_v34 = vadd.f32 %v3672_v31, %v2737_v30  ;;  %v3674_v36 = vpop.f32.mrf.mxu1 }
 0x151   : > { %v3692_v37 = vpop.f32.mrf.mxu0 }
 0x152   : > { %v3714_v38 = vpop.f32.mrf.mxu1 }
 0x153   : > { %v3693_v39 = vpop.f32.mrf.mxu0 }
 0x154   : > { %v3694_v40 = vadd.f32 %v3693_v39, %v3692_v37  ;;  %v3715_v42 = vpop.f32.mrf.mxu1 }
 0x155   : > { %v3695_v43 = vpop.f32.mrf.mxu0  ;;  %v3716_v45 = vadd.f32 %v3715_v42, %v3714_v38 }
 0x156   : > { %v2817_v44 = vadd.f32 %v3694_v40, %v2777_v34  ;;  %v3717_v46 = vpop.f32.mrf.mxu1 }
 0x157   : > { %v3696_v47 = vpop.f32.mrf.mxu0 }
 0x158   : > { %v2857_v48 = vadd.f32 %v3716_v45, %v2817_v44  ;;  %v3718_v49 = vpop.f32.mrf.mxu1 }
 0x171   : > { %v3736_v50 = vpop.f32.mrf.mxu0 }
 0x172   : > { %v3758_v51 = vpop.f32.mrf.mxu1 }
 0x173   : > { %v3737_v52 = vpop.f32.mrf.mxu0 }
 0x174   : > { %v3738_v53 = vadd.f32 %v3737_v52, %v3736_v50  ;;  %v3759_v54 = vpop.f32.mrf.mxu1 }
 0x175   : > { %v3739_v55 = vpop.f32.mrf.mxu0  ;;  %v3760_v57 = vadd.f32 %v3759_v54, %v3758_v51 }
 0x176   : > { %v2897_v56 = vadd.f32 %v3738_v53, %v2857_v48  ;;  %v3761_v58 = vpop.f32.mrf.mxu1 }
 0x177   : > { %v3740_v59 = vpop.f32.mrf.mxu0 }
 0x178   : > { %v2937_v60 = vadd.f32 %v3760_v57, %v2897_v56  ;;  %v3762_v61 = vpop.f32.mrf.mxu1 }
 0x191   : > { %v3780_v62 = vpop.f32.mrf.mxu0 }
 0x192   : > { %v3802_v63 = vpop.f32.mrf.mxu1 }
 0x193   : > { %v3781_v0 = vpop.f32.mrf.mxu0 }
 0x194   : > { %v3803_v1 = vpop.f32.mrf.mxu1  ;;  %v3782_v14 = vadd.f32 %v3781_v0, %v3780_v62 }
 0x195   : > { %v3783_v2 = vpop.f32.mrf.mxu0  ;;  %v3804_v16 = vadd.f32 %v3803_v1, %v3802_v63 }
 0x196   : > { %v3805_v3 = vpop.f32.mrf.mxu1  ;;  %v2977_v15 = vadd.f32 %v3782_v14, %v2937_v60 }
 0x197   : > { %v3784_v4 = vpop.f32.mrf.mxu0 }
 0x198   : > { %v3806_v5 = vpop.f32.mrf.mxu1  ;;  %v3017_v18 = vadd.f32 %v3804_v16, %v2977_v15 }
 0x1b1   : > { %v3824_v6 = vpop.f32.mrf.mxu0 }
 0x1b2   : > { %v3846_v7 = vpop.f32.mrf.mxu1 }
 0x1b3   : > { %v3825_v8 = vpop.f32.mrf.mxu0 }
 0x1b4   : > { %v3847_v9 = vpop.f32.mrf.mxu1  ;;  %v3826_v17 = vadd.f32 %v3825_v8, %v3824_v6 }
 0x1b5   : > { %v3827_v10 = vpop.f32.mrf.mxu0  ;;  %v3848_v20 = vadd.f32 %v3847_v9, %v3846_v7 }
 0x1b6   : > { %v3849_v11 = vpop.f32.mrf.mxu1  ;;  %v3057_v19 = vadd.f32 %v3826_v17, %v3017_v18 }
 0x1b7   : > { %v3828_v12 = vpop.f32.mrf.mxu0 }
 0x1b8   : > { %v3850_v13 = vpop.f32.mrf.mxu1  ;;  %v3097_v35 = vadd.f32 %v3848_v20, %v3057_v19 }
 0x1d1   : > { %v3868_v21 = vpop.f32.mrf.mxu0 }
 0x1d2   : > { %v3890_v22 = vpop.f32.mrf.mxu1 }
 0x1d3   : > { %v3869_v23 = vpop.f32.mrf.mxu0 }
 0x1d4   : > { %v3870_v24 = vadd.f32 %v3869_v23, %v3868_v21  ;;  %v3891_v25 = vpop.f32.mrf.mxu1 }
 0x1d5   : > { %v3871_v26 = vpop.f32.mrf.mxu0  ;;  %v3892_v28 = vadd.f32 %v3891_v25, %v3890_v22 }
 0x1d6   : > { %v3137_v27 = vadd.f32 %v3870_v24, %v3097_v35  ;;  %v3893_v30 = vpop.f32.mrf.mxu1 }
 0x1d7   : > { %v3872_v31 = vpop.f32.mrf.mxu0 }
 0x1d8   : > { %v3177_v32 = vadd.f32 %v3892_v28, %v3137_v27  ;;  %v3894_v33 = vpop.f32.mrf.mxu1 }
 0x1da   : > { %v3182_v34 = vadd.f32 %v3177_v32, %v257_v29 }
 0x1dc   : > { %3183 = vst [vmem:[%s4572_s30] sm:$0x3] %v3182_v34 }
 0x1dd PF: > { %s13_s14 = sadd.s32 1, %s4203_s14   ;;  %s4590_s12 = smov %s4199_s13 }
 0x1de   : > { %p10_p5 = scmp.ge.s32.totalorder %s13_s14, 4   ;;  %s4591_s13 = smov %s4593_s15 }
 0x1e0   :  { %12 = sbr.rel (!%p10_p5) target bundleno = 2 (0x2), region = 72 }

</bundles_post_ra>
